<compile_context>
chip_gen: v7x
topology: tpu7x:2x2x1
jax: 0.10.0
libtpu: 0.0.40
codegen_flags: <defaults>
</compile_context>

<pallas_src>
import functools
import math

import jax
import jax.numpy as jnp
from jax.experimental import pallas as pl
from jax.experimental.pallas import tpu as pltpu

_SUB = 8                  # sublane tile: rows per chunk
_RESEED_CHUNKS = 8        # chunks per reseed group -> true sin every 64 rows
_GROUP_ROWS = _SUB * _RESEED_CHUNKS


def _cdiv(a: int, b: int) -> int:
    return -(-a // b)


def _pos_table_kernel(consts_ref, o_ref, *, ratio: int, reseed: int):
    """Writes one (chunks, 8, C) block of the row-major-flattened (S, E) table.

    Flat element f = (chunk*8 + sub)*C + lane maps to
        pos = row*ratio + lane//E,  col = lane % E        (row = chunk*8 + sub)
    value = sin(pos * inv_freq(col) + phase(col))   (phase = pi/2 on odd cols).

    Per `reseed`-chunk group: chunk 0 is seeded with true sin/cos (EUP), the
    following chunks are produced by rotating (sin, cos) by the constant
    per-chunk angle step d8 = 8*ratio*inv_freq (VPU only, no transcendentals).
    """
    n_chunks, sub, C = o_ref.shape
    n_groups = n_chunks // reseed
    chunk0 = pl.program_id(0) * n_chunks          # first global chunk of block

    inv_freq = consts_ref[0:1, :]                 # (1, C)
    phase    = consts_ref[1:2, :]
    pos_lane = consts_ref[2:3, :]
    sin_d    = consts_ref[3:4, :]                 # sin(8*ratio*inv_freq)
    cos_d    = consts_ref[4:5, :]                 # cos(8*ratio*inv_freq)

    sub_iota = jax.lax.broadcasted_iota(jnp.int32, (sub, 1), 0)

    @pl.loop(0, n_groups)
    def _(g):
        local = g * reseed                        # chunk index within the block
        row0 = (chunk0 + local) * sub             # global flat row of seed chunk
        # Exact integer position -> one rounding in pos*inv_freq (matches ref).
        pos = ((row0 + sub_iota) * ratio).astype(jnp.float32) + pos_lane
        angle = pos * inv_freq + phase            # (sub, C)
        s = jnp.sin(angle)                        # EUP (seed)
        c = jnp.sin(angle + (math.pi / 2.0))      # cos via the same EUP op
        o_ref[local] = s
        for j in range(1, reseed):                # VPU-only rotation recurrence
            s, c = s * cos_d + c * sin_d, c * cos_d - s * sin_d
            o_ref[local + j] = s


def _block_budget_bytes():
    """Generation-aware per-block output budget (Pallas double-buffers it)."""
    try:
        cap = int(pltpu.get_tpu_info().vmem_capacity_bytes)
    except Exception:
        cap = 64 * 1024 * 1024                    # v7x-safe assumption
    block = max(4 * 1024 * 1024, min(cap // 6, 14 * 1024 * 1024))
    vmem_limit = min(cap // 2, 48 * 1024 * 1024)
    return block, vmem_limit


@functools.lru_cache(maxsize=None)
def _build_table(max_len: int, embed_size: int):
    """(max_len, embed_size) float32 sinusoid table (cached, like torch __init__)."""
    assert embed_size % 2 == 0, "embed_size must be even (sin/cos pairs)"
    E = embed_size
    C = E * (128 // math.gcd(E, 128))             # lcm(E, 128): lane-dense width
    ratio = C // E                                # positions per flat row (power of 2)

    # Per-lane constants, computed once in the wrapper (not per grid step).
    lane = jnp.arange(C, dtype=jnp.int32)
    col = lane % E
    pos_lane = (lane // E).astype(jnp.float32)
    two_i = (2 * (col // 2)).astype(jnp.float32)
    inv_freq = 1.0 / (10000.0 ** (two_i / E))     # same expression as reference
    phase = (col % 2).astype(jnp.float32) * (math.pi / 2.0)
    d8 = (_SUB * ratio) * inv_freq                # exact (power-of-two scale)
    consts = jnp.zeros((8, C), jnp.float32)
    consts = consts.at[0].set(inv_freq)
    consts = consts.at[1].set(phase)
    consts = consts.at[2].set(pos_lane)
    consts = consts.at[3].set(jnp.sin(d8))
    consts = consts.at[4].set(jnp.cos(d8))

    # --- Tiling: full blocks only; >= 2 grid steps when possible (v7x 2 TCs) --
    rows_needed = _cdiv(max_len * E, C)
    n_groups_total = _cdiv(rows_needed, _GROUP_ROWS)
    block_budget, vmem_limit = _block_budget_bytes()
    groups_per_block_cap = max(1, block_budget // (_GROUP_ROWS * C * 4))
    # With only one 64-row group the whole kernel is sub-microsecond; a single
    # grid step is fine there even on v7x.
    min_blocks = 2 if n_groups_total >= 2 else 1
    groups_per_block = max(1, min(groups_per_block_cap,
                                  _cdiv(n_groups_total, min_blocks)))
    n_blocks = _cdiv(n_groups_total, groups_per_block)
    chunks_per_block = groups_per_block * _RESEED_CHUNKS
    n_chunks_padded = n_blocks * chunks_per_block     # every block is full

    table_flat = pl.pallas_call(
        functools.partial(_pos_table_kernel, ratio=ratio, reseed=_RESEED_CHUNKS),
        out_shape=jax.ShapeDtypeStruct((n_chunks_padded, _SUB, C), jnp.float32),
        grid=(n_blocks,),
        in_specs=[pl.BlockSpec((8, C), lambda i: (0, 0))],          # resident consts
        out_specs=pl.BlockSpec((chunks_per_block, _SUB, C), lambda i: (i, 0, 0)),
        compiler_params=pltpu.CompilerParams(
            dimension_semantics=("parallel",),
            vmem_limit_bytes=int(vmem_limit),
        ),
    )(consts)

    # Drop padding rows and restore the (max_len, E) view.
    return table_flat.reshape(-1)[: max_len * E].reshape(max_len, E)


def position_embedding(tokens_ids, max_len: int, embed_size: int):
    """Pallas equivalent of PositionEmbedding.forward.

    tokens_ids: int array [batch, seq_len] (only the shape is used)
    returns:    float32 [batch, seq_len, embed_size]
    """
    batch, seq_len = tokens_ids.shape
    assert seq_len <= max_len, "seq_len must not exceed max_len"
    table = _build_table(max_len, embed_size)          # cached across calls
    # torch .expand semantics: broadcast only (fuses into the consumer).
    return jnp.broadcast_to(table[:seq_len][None, :, :],
                            (batch, seq_len, embed_size))


def _reference(tokens_ids, max_len, embed_size):
    """Pure-JAX replica of the PyTorch module for verification."""
    pos = jnp.arange(max_len, dtype=jnp.float32)[:, None]            # [max_len, 1]
    _2i = jnp.arange(0, embed_size, 2, dtype=jnp.float32)[None, :]   # [1, E/2]
    angle = pos / (10000.0 ** (_2i / embed_size))
    emb = jnp.zeros((max_len, embed_size), jnp.float32)
    emb = emb.at[:, 0::2].set(jnp.sin(angle))
    emb = emb.at[:, 1::2].set(jnp.cos(angle))
    b, s = tokens_ids.shape
    return jnp.broadcast_to(emb[:s][None], (b, s, embed_size))


if __name__ == "__main__":
    key = jax.random.PRNGKey(0)

    # Small config (module-scale example).
    batch, seq_len, max_len, embed_size = 2, 8, 16, 32
    tokens_ids = jax.random.randint(key, (batch, seq_len), 0, 100, dtype=jnp.int32)
    out = jax.block_until_ready(position_embedding(tokens_ids, max_len, embed_size))
    ref = _reference(tokens_ids, max_len, embed_size)
    assert out.shape == (batch, seq_len, embed_size)
    assert out.dtype == jnp.float32
    assert jnp.allclose(out, ref, atol=1e-5, rtol=1e-5)

    # Slightly larger config: exercises the rotation recurrence, a >=2-step
    # grid and the trailing-row padding path.  Tolerance is looser because the
    # reference divides (pos / 10000**..) while the kernel multiplies by the
    # precomputed reciprocal (~2-ulp angle difference scaling with |angle|),
    # plus a few ulps of rotation drift between reseeds.
    batch2, seq2, max_len2, embed2 = 2, 72, 80, 128
    tok2 = jax.random.randint(jax.random.PRNGKey(1), (batch2, seq2), 0, 100,
                              dtype=jnp.int32)
    out2 = jax.block_until_ready(position_embedding(tok2, max_len2, embed2))
    ref2 = _reference(tok2, max_len2, embed2)
    assert out2.shape == (batch2, seq2, embed2)
    assert jnp.allclose(out2, ref2, atol=5e-5, rtol=1e-5)

    # Cache: a second forward with the same (max_len, E) reuses the table.
    out_again = jax.block_until_ready(position_embedding(tokens_ids, max_len, embed_size))
    assert jnp.array_equal(out, out_again)

    print("KERNEL_OK")
</pallas_src>

<mosaic_0001>
module attributes {stable_mosaic.version = 11 : i64} {
  func.func @_pos_table_kernel(%arg0: i32, %arg1: memref<8x128xf32, #tpu.memory_space<vmem>>, %arg2: memref<8x8x128xf32, #tpu.memory_space<vmem>>) attributes {dimension_semantics = [#tpu.dimension_semantics<parallel>], iteration_bounds = array<i64: 1>, scalar_prefetch = 0 : i64, scratch_operands = 0 : i64, tpu.core_type = #tpu.core_type<tc>, window_params = [{pipeline_mode = #tpu.pipeline_mode<synchronous>, transform_indices = @transform_0, window_bounds = array<i64: 8, 128>}, {transform_indices = @transform_1, window_bounds = array<i64: 8, 8, 128>}]} {
    %c8_i32 = arith.constant 8 : i32
    %0 = arith.muli %arg0, %c8_i32 : i32
    %c0 = arith.constant 0 : index
    %c0_0 = arith.constant 0 : index
    %1 = vector.load %arg1[%c0, %c0_0] : memref<8x128xf32, #tpu.memory_space<vmem>>, vector<1x128xf32>
    %c1 = arith.constant 1 : index
    %c0_1 = arith.constant 0 : index
    %2 = vector.load %arg1[%c1, %c0_1] : memref<8x128xf32, #tpu.memory_space<vmem>>, vector<1x128xf32>
    %c2 = arith.constant 2 : index
    %c0_2 = arith.constant 0 : index
    %3 = vector.load %arg1[%c2, %c0_2] : memref<8x128xf32, #tpu.memory_space<vmem>>, vector<1x128xf32>
    %c3 = arith.constant 3 : index
    %c0_3 = arith.constant 0 : index
    %4 = vector.load %arg1[%c3, %c0_3] : memref<8x128xf32, #tpu.memory_space<vmem>>, vector<1x128xf32>
    %c4 = arith.constant 4 : index
    %c0_4 = arith.constant 0 : index
    %5 = vector.load %arg1[%c4, %c0_4] : memref<8x128xf32, #tpu.memory_space<vmem>>, vector<1x128xf32>
    %6 = tpu.iota {dimensions = array<i32: 0>} : vector<8x1xi32>
    %c0_i32 = arith.constant 0 : i32
    %c1_i32 = arith.constant 1 : i32
    %7 = arith.muli %c0_i32, %c1_i32 : i32
    %c0_i32_5 = arith.constant 0 : i32
    %8 = arith.addi %c0_i32_5, %7 : i32
    %c8_i32_6 = arith.constant 8 : i32
    %9 = arith.muli %8, %c8_i32_6 : i32
    %10 = arith.addi %0, %9 : i32
    %c8_i32_7 = arith.constant 8 : i32
    %11 = arith.muli %10, %c8_i32_7 : i32
    %12 = vector.broadcast %11 : i32 to vector<8x1xi32>
    %13 = arith.addi %12, %6 : vector<8x1xi32>
    %c4_i32 = arith.constant 4 : i32
    %14 = vector.broadcast %c4_i32 : i32 to vector<8x1xi32>
    %15 = arith.muli %13, %14 : vector<8x1xi32>
    %16 = arith.sitofp %15 : vector<8x1xi32> to vector<8x1xf32>
    %17 = vector.broadcast %16 : vector<8x1xf32> to vector<8x128xf32>
    %18 = vector.broadcast %3 : vector<1x128xf32> to vector<8x128xf32>
    %19 = arith.addf %17, %18 : vector<8x128xf32>
    %20 = vector.broadcast %1 : vector<1x128xf32> to vector<8x128xf32>
    %21 = arith.mulf %19, %20 : vector<8x128xf32>
    %22 = vector.broadcast %2 : vector<1x128xf32> to vector<8x128xf32>
    %23 = arith.addf %21, %22 : vector<8x128xf32>
    %24 = math.sin %23 : vector<8x128xf32>
    %cst = arith.constant 1.57079637 : f32
    %25 = vector.broadcast %cst : f32 to vector<8x128xf32>
    %26 = arith.addf %23, %25 : vector<8x128xf32>
    %27 = math.sin %26 : vector<8x128xf32>
    %28 = arith.index_cast %9 : i32 to index
    %c0_8 = arith.constant 0 : index
    %c0_9 = arith.constant 0 : index
    %29 = vector.load %arg2[%28, %c0_8, %c0_9] : memref<8x8x128xf32, #tpu.memory_space<vmem>>, vector<1x8x128xf32>
    %30 = vector.shape_cast %29 : vector<1x8x128xf32> to vector<8x128xf32>
    %31 = vector.shape_cast %24 : vector<8x128xf32> to vector<1x8x128xf32>
    tpu.vector_store %arg2[%28, %c0_8, %c0_9], %31 {strides = array<i32>} : memref<8x8x128xf32, #tpu.memory_space<vmem>>, vector<1x8x128xf32>,
    %32 = vector.broadcast %5 : vector<1x128xf32> to vector<8x128xf32>
    %33 = arith.mulf %24, %32 : vector<8x128xf32>
    %34 = vector.broadcast %4 : vector<1x128xf32> to vector<8x128xf32>
    %35 = arith.mulf %27, %34 : vector<8x128xf32>
    %36 = arith.addf %33, %35 : vector<8x128xf32>
    %37 = vector.broadcast %5 : vector<1x128xf32> to vector<8x128xf32>
    %38 = arith.mulf %27, %37 : vector<8x128xf32>
    %39 = vector.broadcast %4 : vector<1x128xf32> to vector<8x128xf32>
    %40 = arith.mulf %24, %39 : vector<8x128xf32>
    %41 = arith.subf %38, %40 : vector<8x128xf32>
    %c1_i32_10 = arith.constant 1 : i32
    %42 = arith.addi %9, %c1_i32_10 : i32
    %43 = arith.index_cast %42 : i32 to index
    %c0_11 = arith.constant 0 : index
    %c0_12 = arith.constant 0 : index
    %44 = vector.load %arg2[%43, %c0_11, %c0_12] : memref<8x8x128xf32, #tpu.memory_space<vmem>>, vector<1x8x128xf32>
    %45 = vector.shape_cast %44 : vector<1x8x128xf32> to vector<8x128xf32>
    %46 = vector.shape_cast %36 : vector<8x128xf32> to vector<1x8x128xf32>
    tpu.vector_store %arg2[%43, %c0_11, %c0_12], %46 {strides = array<i32>} : memref<8x8x128xf32, #tpu.memory_space<vmem>>, vector<1x8x128xf32>,
    %47 = vector.broadcast %5 : vector<1x128xf32> to vector<8x128xf32>
    %48 = arith.mulf %36, %47 : vector<8x128xf32>
    %49 = vector.broadcast %4 : vector<1x128xf32> to vector<8x128xf32>
    %50 = arith.mulf %41, %49 : vector<8x128xf32>
    %51 = arith.addf %48, %50 : vector<8x128xf32>
    %52 = vector.broadcast %5 : vector<1x128xf32> to vector<8x128xf32>
    %53 = arith.mulf %41, %52 : vector<8x128xf32>
    %54 = vector.broadcast %4 : vector<1x128xf32> to vector<8x128xf32>
    %55 = arith.mulf %36, %54 : vector<8x128xf32>
    %56 = arith.subf %53, %55 : vector<8x128xf32>
    %c2_i32 = arith.constant 2 : i32
    %57 = arith.addi %9, %c2_i32 : i32
    %58 = arith.index_cast %57 : i32 to index
    %c0_13 = arith.constant 0 : index
    %c0_14 = arith.constant 0 : index
    %59 = vector.load %arg2[%58, %c0_13, %c0_14] : memref<8x8x128xf32, #tpu.memory_space<vmem>>, vector<1x8x128xf32>
    %60 = vector.shape_cast %59 : vector<1x8x128xf32> to vector<8x128xf32>
    %61 = vector.shape_cast %51 : vector<8x128xf32> to vector<1x8x128xf32>
    tpu.vector_store %arg2[%58, %c0_13, %c0_14], %61 {strides = array<i32>} : memref<8x8x128xf32, #tpu.memory_space<vmem>>, vector<1x8x128xf32>,
    %62 = vector.broadcast %5 : vector<1x128xf32> to vector<8x128xf32>
    %63 = arith.mulf %51, %62 : vector<8x128xf32>
    %64 = vector.broadcast %4 : vector<1x128xf32> to vector<8x128xf32>
    %65 = arith.mulf %56, %64 : vector<8x128xf32>
    %66 = arith.addf %63, %65 : vector<8x128xf32>
    %67 = vector.broadcast %5 : vector<1x128xf32> to vector<8x128xf32>
    %68 = arith.mulf %56, %67 : vector<8x128xf32>
    %69 = vector.broadcast %4 : vector<1x128xf32> to vector<8x128xf32>
    %70 = arith.mulf %51, %69 : vector<8x128xf32>
    %71 = arith.subf %68, %70 : vector<8x128xf32>
    %c3_i32 = arith.constant 3 : i32
    %72 = arith.addi %9, %c3_i32 : i32
    %73 = arith.index_cast %72 : i32 to index
    %c0_15 = arith.constant 0 : index
    %c0_16 = arith.constant 0 : index
    %74 = vector.load %arg2[%73, %c0_15, %c0_16] : memref<8x8x128xf32, #tpu.memory_space<vmem>>, vector<1x8x128xf32>
    %75 = vector.shape_cast %74 : vector<1x8x128xf32> to vector<8x128xf32>
    %76 = vector.shape_cast %66 : vector<8x128xf32> to vector<1x8x128xf32>
    tpu.vector_store %arg2[%73, %c0_15, %c0_16], %76 {strides = array<i32>} : memref<8x8x128xf32, #tpu.memory_space<vmem>>, vector<1x8x128xf32>,
    %77 = vector.broadcast %5 : vector<1x128xf32> to vector<8x128xf32>
    %78 = arith.mulf %66, %77 : vector<8x128xf32>
    %79 = vector.broadcast %4 : vector<1x128xf32> to vector<8x128xf32>
    %80 = arith.mulf %71, %79 : vector<8x128xf32>
    %81 = arith.addf %78, %80 : vector<8x128xf32>
    %82 = vector.broadcast %5 : vector<1x128xf32> to vector<8x128xf32>
    %83 = arith.mulf %71, %82 : vector<8x128xf32>
    %84 = vector.broadcast %4 : vector<1x128xf32> to vector<8x128xf32>
    %85 = arith.mulf %66, %84 : vector<8x128xf32>
    %86 = arith.subf %83, %85 : vector<8x128xf32>
    %c4_i32_17 = arith.constant 4 : i32
    %87 = arith.addi %9, %c4_i32_17 : i32
    %88 = arith.index_cast %87 : i32 to index
    %c0_18 = arith.constant 0 : index
    %c0_19 = arith.constant 0 : index
    %89 = vector.load %arg2[%88, %c0_18, %c0_19] : memref<8x8x128xf32, #tpu.memory_space<vmem>>, vector<1x8x128xf32>
    %90 = vector.shape_cast %89 : vector<1x8x128xf32> to vector<8x128xf32>
    %91 = vector.shape_cast %81 : vector<8x128xf32> to vector<1x8x128xf32>
    tpu.vector_store %arg2[%88, %c0_18, %c0_19], %91 {strides = array<i32>} : memref<8x8x128xf32, #tpu.memory_space<vmem>>, vector<1x8x128xf32>,
    %92 = vector.broadcast %5 : vector<1x128xf32> to vector<8x128xf32>
    %93 = arith.mulf %81, %92 : vector<8x128xf32>
    %94 = vector.broadcast %4 : vector<1x128xf32> to vector<8x128xf32>
    %95 = arith.mulf %86, %94 : vector<8x128xf32>
    %96 = arith.addf %93, %95 : vector<8x128xf32>
    %97 = vector.broadcast %5 : vector<1x128xf32> to vector<8x128xf32>
    %98 = arith.mulf %86, %97 : vector<8x128xf32>
    %99 = vector.broadcast %4 : vector<1x128xf32> to vector<8x128xf32>
    %100 = arith.mulf %81, %99 : vector<8x128xf32>
    %101 = arith.subf %98, %100 : vector<8x128xf32>
    %c5_i32 = arith.constant 5 : i32
    %102 = arith.addi %9, %c5_i32 : i32
    %103 = arith.index_cast %102 : i32 to index
    %c0_20 = arith.constant 0 : index
    %c0_21 = arith.constant 0 : index
    %104 = vector.load %arg2[%103, %c0_20, %c0_21] : memref<8x8x128xf32, #tpu.memory_space<vmem>>, vector<1x8x128xf32>
    %105 = vector.shape_cast %104 : vector<1x8x128xf32> to vector<8x128xf32>
    %106 = vector.shape_cast %96 : vector<8x128xf32> to vector<1x8x128xf32>
    tpu.vector_store %arg2[%103, %c0_20, %c0_21], %106 {strides = array<i32>} : memref<8x8x128xf32, #tpu.memory_space<vmem>>, vector<1x8x128xf32>,
    %107 = vector.broadcast %5 : vector<1x128xf32> to vector<8x128xf32>
    %108 = arith.mulf %96, %107 : vector<8x128xf32>
    %109 = vector.broadcast %4 : vector<1x128xf32> to vector<8x128xf32>
    %110 = arith.mulf %101, %109 : vector<8x128xf32>
    %111 = arith.addf %108, %110 : vector<8x128xf32>
    %112 = vector.broadcast %5 : vector<1x128xf32> to vector<8x128xf32>
    %113 = arith.mulf %101, %112 : vector<8x128xf32>
    %114 = vector.broadcast %4 : vector<1x128xf32> to vector<8x128xf32>
    %115 = arith.mulf %96, %114 : vector<8x128xf32>
    %116 = arith.subf %113, %115 : vector<8x128xf32>
    %c6_i32 = arith.constant 6 : i32
    %117 = arith.addi %9, %c6_i32 : i32
    %118 = arith.index_cast %117 : i32 to index
    %c0_22 = arith.constant 0 : index
    %c0_23 = arith.constant 0 : index
    %119 = vector.load %arg2[%118, %c0_22, %c0_23] : memref<8x8x128xf32, #tpu.memory_space<vmem>>, vector<1x8x128xf32>
    %120 = vector.shape_cast %119 : vector<1x8x128xf32> to vector<8x128xf32>
    %121 = vector.shape_cast %111 : vector<8x128xf32> to vector<1x8x128xf32>
    tpu.vector_store %arg2[%118, %c0_22, %c0_23], %121 {strides = array<i32>} : memref<8x8x128xf32, #tpu.memory_space<vmem>>, vector<1x8x128xf32>,
    %122 = vector.broadcast %5 : vector<1x128xf32> to vector<8x128xf32>
    %123 = arith.mulf %111, %122 : vector<8x128xf32>
    %124 = vector.broadcast %4 : vector<1x128xf32> to vector<8x128xf32>
    %125 = arith.mulf %116, %124 : vector<8x128xf32>
    %126 = arith.addf %123, %125 : vector<8x128xf32>
    %c7_i32 = arith.constant 7 : i32
    %127 = arith.addi %9, %c7_i32 : i32
    %128 = arith.index_cast %127 : i32 to index
    %c0_24 = arith.constant 0 : index
    %c0_25 = arith.constant 0 : index
    %129 = vector.load %arg2[%128, %c0_24, %c0_25] : memref<8x8x128xf32, #tpu.memory_space<vmem>>, vector<1x8x128xf32>
    %130 = vector.shape_cast %129 : vector<1x8x128xf32> to vector<8x128xf32>
    %131 = vector.shape_cast %126 : vector<8x128xf32> to vector<1x8x128xf32>
    tpu.vector_store %arg2[%128, %c0_24, %c0_25], %131 {strides = array<i32>} : memref<8x8x128xf32, #tpu.memory_space<vmem>>, vector<1x8x128xf32>,
    %c1_i32_26 = arith.constant 1 : i32
    return
  }
  func.func @transform_0(%arg0: i32) -> (i32, i32) {
    %c0_i32 = arith.constant 0 : i32
    %c0_i32_0 = arith.constant 0 : i32
    %c0_i32_1 = arith.constant 0 : i32
    return %c0_i32, %c0_i32_0 : i32, i32
  }
  func.func @transform_1(%arg0: i32) -> (i32, i32, i32) {
    %c0_i32 = arith.constant 0 : i32
    %c0_i32_0 = arith.constant 0 : i32
    %c0_i32_1 = arith.constant 0 : i32
    return %arg0, %c0_i32, %c0_i32_0 : i32, i32, i32
  }
}

</mosaic_0001>

<bundles_post_ra>
// kernel: tpu_custom_call.1
= control target key start
LH: loop header
LB: loop body
LE: loop exit
PB: predicated region body
PF: predicated region fallthrough
CT: control target
= control target key end

     0   :  { %6 = vsyncpa [#allocation3], 0  ;;  %s544_s0 = inlined_call_operand.hbm [shape: f32[8,128], index: 0, kind: input, shape index: {}]   ;;  %s545_s1 = inlined_call_operand.hbm [shape: f32[8,8,128], index: 1, kind: output, shape index: {}]  }
   0x1   :  { %7 = vsyncpa [#allocation4], 0  ;;  %s423_s6 = smov [#allocation2]   ;;  %s375_s10 = scalar_lea.hbm %s544_s0, 128 }
   0x2   :  { %s14_s7 = sshll.u32 %s423_s6, 4  ;;  %p376_p0 = scmp.ne.s32.totalorder %s544_s0, %s375_s10  ;;  %s15_s7 = int_to_ptr.vmem [resolvable:$true] %s14_s7 }
   0x3   :  { %p379_p1 = scmp.lt.u32.totalorder %s375_s10, %s544_s0 }
   0x5   :  { %p381_p2 = pnand %p379_p1, %p376_p0 }
   0x7   :  { %384 = shalt.err (!%p381_p2)
}
   0x8   :  { %s385_s15 = scalar_lea.vmem %s15_s7, 128  ;;  %p390_p4 = scmp.lt.s32.totalorder %s15_s7, %s15_s7 }
   0x9   :  { %p386_p3 = scmp.ne.s32.totalorder %s15_s7, %s385_s15  ;;  %p391_p5 = scmp.lt.s32.totalorder %s385_s15, %s385_s15 }
   0xb   :  { %p392_p6 = por %p391_p5, %p390_p4 }
   0xd   :  { %p393_p7 = pnand %p392_p6, %p386_p3 }
   0xf   :  { %396 = shalt.err (!%p393_p7)
}
  0x10   :  { %17 = dma.hbm_to_vmem [thread:$0]  %s544_s0, 128, %s15_s7, [#allocation3]  }
  0x11   :  { %419 = dma.done.wait [#allocation3], 128  }
  0x12   :  { %420 = vsyncadd [#allocation3], 4294967168  ;;  %v26_v0 = vlaneseq  ;;  %v337_v4 = vld [vmem:[#allocation2] ss:$0 sm:$0xff]  ;;  %v336_v5 = vld [vmem:[#allocation2 + $0x2] ss:$0 sm:$0xff] }
  0x13   :  { %v338_v7 = vld [vmem:[#allocation2 + $0x1] ss:$0 sm:$0xff]  ;;  %v424_v30 = vmov 683565275   ;;  %v425_v32 = vmov 2475754826  }
  0x14   :  { %v27_v1 = vshrl.u32 %v26_v0, 7  ;;  %v426_v34 = vmov 2131351028   ;;  %v427_v36 = vmov 2102212464   ;;  %s430_s0 = smov [#allocation5]  }
  0x15   :  { %v428_v38 = vmov 920167782   ;;  %v429_v45 = vmov 1326507024   ;;  %s324_s18 = sshll.u32 %s430_s0, 4  ;;  %s325_s18 = int_to_ptr.vmem [resolvable:$true] %s324_s18 }
  0x16   :  { %v31_v2 = vmul.u32 4, %v27_v1  ;;  %s397_s19 = scalar_lea.vmem %s325_s18, 1024  ;;  %p402_p9 = scmp.lt.s32.totalorder %s325_s18, %s325_s18 }
  0x17   :  { %p398_p8 = scmp.ne.s32.totalorder %s325_s18, %s397_s19  ;;  %p403_p10 = scmp.lt.s32.totalorder %s397_s19, %s397_s19 }
  0x18   :  { %v32_v3 = vcvt.s32.f32 %v31_v2 }
  0x19   :  { %p404_p11 = por %p403_p10, %p402_p9 }
  0x1a   :  { %v37_v6 = vadd.f32 %v336_v5, %v32_v3 }
  0x1b   :  { %p405_p12 = pnand %p404_p11, %p398_p8 }
  0x1c   :  { %v42_v8 = vmul.f32 %v337_v4, %v37_v6 }
  0x1e   :  { %v455_v9 = vadd.f32 %v338_v7, %v42_v8 }
  0x20   :  { %v48_v10 = vand.u32 2147483647, %v455_v9  ;;  %v51_v11 = vand.u32 2139095040, %v455_v9  ;;  %v460_v12 = vadd.f32 1.5707964, %v455_v9  ;;  %vm50_vm14 = vcmp.lt.s32.totalorder %v455_v9, 0 }
  0x22   :  { %v52_v13 = vshrl.u32 %v51_v11, 23  ;;  %v55_v14 = vand.u32 8388607, %v48_v10  ;;  %v153_v15 = vand.u32 2147483647, %v460_v12  ;;  %v156_v16 = vand.u32 2139095040, %v460_v12 }
  0x23   :  { %vm49_vm15 = vcmp.le.f32.partialorder %v48_v10, 0.7853982 }
  0x24   :  { %v339_v17 = vadd.s32 4294967169, %v52_v13  ;;  %v157_v18 = vshrl.u32 %v156_v16, 23  ;;  %v56_v20 = vor.u32 8388608, %v55_v14  ;;  %v468_v22 = vand.u32 8388607, %v153_v15 }
  0x26   :  { %v58_v19 = vadd.s32 1, %v339_v17  ;;  %v343_v21 = vadd.s32 4294967169, %v157_v18  ;;  %v470_v27 = vshll.u32 %v56_v20, 8  ;;  %v161_v28 = vor.u32 8388608, %v468_v22 }
  0x28   :  { %vm59_vm0 = vcmp.gt.s32.totalorder %v58_v19, 0  ;;  %v163_v24 = vadd.s32 1, %v343_v21 }
  0x29   :  { %v60_v23 = vsel %vm59_vm0, %v58_v19, 0  ;;  %vm155_vm0 = vcmp.lt.s32.totalorder %v460_v12, 0 }
  0x2a   :  { %v61_v25 = vshrl.u32 %v60_v23, 5  ;;  %v62_v26 = vand.u32 31, %v60_v23  ;;  %vm164_vm1 = vcmp.gt.s32.totalorder %v163_v24, 0 }
  0x2b   :  { %v165_v50 = vsel %vm164_vm1, %v163_v24, 0  ;;  %vm521_vm1 = vcmp.le.f32.partialorder %v153_v15, 0.7853982 }
  0x2c   :  { %v63_v29 = vsub.s32 32, %v62_v26  ;;  %v65_v31 = vshll.u32 %v424_v30, %v62_v26  ;;  %v68_v33 = vshll.u32 %v425_v32, %v62_v26  ;;  %v71_v35 = vshll.u32 %v426_v34, %v62_v26 }
  0x2d   :  { %v74_v37 = vshll.u32 %v427_v36, %v62_v26  ;;  %v77_v39 = vshll.u32 %v428_v38, %v62_v26  ;;  %vm80_vm2 = vcmp.lt.s32.totalorder %v61_v25, 1  ;;  %vm81_vm3 = vcmp.lt.s32.totalorder %v61_v25, 2 }
  0x2e   :  { %v64_v40 = vshrl.u32 %v424_v30, %v63_v29  ;;  %v66_v41 = vshrl.u32 %v425_v32, %v63_v29  ;;  %v69_v42 = vshrl.u32 %v426_v34, %v63_v29  ;;  %v72_v43 = vshrl.u32 %v427_v36, %v63_v29 }
  0x2f   :  { %v75_v44 = vshrl.u32 %v428_v38, %v63_v29  ;;  %v78_v46 = vshrl.u32 %v429_v45, %v63_v29  ;;  %vm82_vm4 = vcmp.lt.s32.totalorder %v61_v25, 3  ;;  %vm83_vm5 = vcmp.lt.s32.totalorder %v61_v25, 4 }
  0x30   :  { %v67_v47 = vor.u32 %v66_v41, %v65_v31  ;;  %v70_v48 = vor.u32 %v69_v42, %v68_v33  ;;  %v73_v49 = vor.u32 %v72_v43, %v71_v35  ;;  %v166_v53 = vshrl.u32 %v165_v50, 5 }
  0x31   :  { %v76_v51 = vor.u32 %v75_v44, %v74_v37  ;;  %v79_v52 = vor.u32 %v78_v46, %v77_v39  ;;  %v167_v54 = vand.u32 31, %v165_v50 }
  0x32   :  { %v84_v55 = vsel %vm80_vm2, %v64_v40, %v67_v47  ;;  %v85_v56 = vsel %vm83_vm5, %v73_v49, 2102212464  ;;  %v88_v57 = vsel %vm80_vm2, %v67_v47, %v70_v48  ;;  %v92_v58 = vsel %vm80_vm2, %v70_v48, %v73_v49 }
  0x33   :  { %v86_v59 = vsel %vm82_vm4, %v70_v48, %v85_v56  ;;  %v89_v60 = vsel %vm83_vm5, %v76_v51, 920167782  ;;  %v93_v61 = vsel %vm83_vm5, %v79_v52, 1326507024  ;;  %v168_v62 = vsub.s32 32, %v167_v54 }
  0x34   :  { %v87_v63 = vsel %vm81_vm3, %v84_v55, %v86_v59  ;;  %v90_v0 = vsel %vm82_vm4, %v73_v49, %v89_v60  ;;  %v94_v1 = vsel %vm82_vm4, %v76_v51, %v93_v61  ;;  %v170_v2 = vshll.u32 %v424_v30, %v167_v54 }
  0x35   :  { %v91_v3 = vsel %vm81_vm3, %v88_v57, %v90_v0  ;;  %v95_v4 = vsel %vm81_vm3, %v92_v58, %v94_v1  ;;  %v103_v5 = vmul.u32 %v470_v27, %v87_v63  ;;  %v169_v6 = vshrl.u32 %v424_v30, %v168_v62 }
  0x36   :  { %v485_v7 = vmul.u32.u64.low %v470_v27, %v95_v4  ;;  %v486_v8 = vmul.u32.u64.high %v470_v27, %v95_v4, %v485_v7  ;;  %v489_v11 = vmul.u32.u64.low %v470_v27, %v91_v3  ;;  %v490_v13 = vmul.u32.u64.high %v470_v27, %v91_v3, %v489_v11 }
  0x37   :  { %v171_v14 = vshrl.u32 %v425_v32, %v168_v62  ;;  %v173_v16 = vshll.u32 %v425_v32, %v167_v54  ;;  %v174_v17 = vshrl.u32 %v426_v34, %v168_v62  ;;  %v176_v18 = vshll.u32 %v426_v34, %v167_v54 }
  0x38   :  { %v177_v19 = vshrl.u32 %v427_v36, %v168_v62  ;;  %v179_v20 = vshll.u32 %v427_v36, %v167_v54  ;;  %v180_v21 = vshrl.u32 %v428_v38, %v168_v62  ;;  %v182_v23 = vshll.u32 %v428_v38, %v167_v54 }
  0x39   :  { %v172_v24 = vor.u32 %v171_v14, %v170_v2  ;;  %v175_v25 = vor.u32 %v174_v17, %v173_v16  ;;  %v183_v26 = vshrl.u32 %v429_v45, %v168_v62  ;;  %vm185_vm6 = vcmp.lt.s32.totalorder %v166_v53, 1 }
  0x3a   :  { %vm105_vm7 = vc.u32 %v486_v8, %v489_v11  ;;  %v106_v29 = vadd.s32 1, %v490_v13  ;;  %v178_v30 = vor.u32 %v177_v19, %v176_v18  ;;  %v201_v27 = vshll.u32 %v161_v28, 8 }
  0x3b   :  { %v181_v31 = vor.u32 %v180_v21, %v179_v20  ;;  %v184_v32 = vor.u32 %v183_v26, %v182_v23  ;;  %vm186_vm8 = vcmp.lt.s32.totalorder %v166_v53, 2  ;;  %vm187_vm9 = vcmp.lt.s32.totalorder %v166_v53, 3 }
  0x3c   :  { %v107_v33 = vsel %vm105_vm7, %v106_v29, %v490_v13  ;;  %vm188_vm10 = vcmp.lt.s32.totalorder %v166_v53, 4  ;;  %v189_v34 = vsel %vm185_vm6, %v169_v6, %v172_v24  ;;  %v193_v35 = vsel %vm185_vm6, %v172_v24, %v175_v25 }
  0x3d   :  { %v108_v36 = vadd.s32 %v107_v33, %v103_v5  ;;  %v190_v37 = vsel %vm188_vm10, %v178_v30, 2102212464  ;;  %v194_v38 = vsel %vm188_vm10, %v181_v31, 920167782  ;;  %v197_v39 = vsel %vm185_vm6, %v175_v25, %v178_v30 }
  0x3e   :  { %v191_v40 = vsel %vm187_vm9, %v175_v25, %v190_v37  ;;  %v195_v41 = vsel %vm187_vm9, %v178_v30, %v194_v38  ;;  %v198_v22 = vsel %vm188_vm10, %v184_v32, 1326507024  ;;  %v104_v0 = vadd.s32 %v489_v11, %v486_v8 }
  0x3f   :  { %v109_v28 = vadd.s32 536870912, %v108_v36  ;;  %v196_v42 = vsel %vm186_vm8, %v193_v35, %v195_v41  ;;  %v199_v43 = vsel %vm187_vm9, %v181_v31, %v198_v22  ;;  %v192_v44 = vsel %vm186_vm8, %v189_v34, %v191_v40 }
  0x40   :  { %v200_v45 = vsel %vm186_vm8, %v197_v39, %v199_v43  ;;  %v503_v46 = vmul.u32.u64.low %v201_v27, %v196_v42  ;;  %v504_v47 = vmul.u32.u64.high %v201_v27, %v196_v42, %v503_v46  ;;  %v208_v52 = vmul.u32 %v201_v27, %v192_v44 }
  0x41   :  { %v110_v48 = vshrl.u32 %v109_v28, 30  ;;  %v506_v49 = vmul.u32.u64.low %v201_v27, %v200_v45  ;;  %v507_v50 = vmul.u32.u64.high %v201_v27, %v200_v45, %v506_v49  ;;  %vm140_vm5 = vweird.f32 %v455_v9 }
  0x42   :  { %v211_v54 = vadd.s32 1, %v504_v47  ;;  %vm245_vm9 = vweird.f32 %v460_v12 }
  0x43   :  { %v111_v51 = vshll.u32 %v110_v48, 30  ;;  %vm210_vm11 = vc.u32 %v507_v50, %v503_v46  ;;  %v134_v24 = vsub.s32 4, %v110_v48  ;;  %v209_v8 = vadd.s32 %v503_v46, %v507_v50 }
  0x44   :  { %v212_v56 = vsel %vm210_vm11, %v211_v54, %v504_v47 }
  0x45   :  { %v112_v55 = vsub.s32 %v108_v36, %v111_v51  ;;  %v213_v58 = vadd.s32 %v212_v56, %v208_v52  ;;  %v135_v31 = vsel %vm50_vm14, %v134_v24, %v110_v48 }
  0x46   :  { %v137_v36 = vsel %vm49_vm15, 0, %v135_v31 }
  0x47   :  { %v114_v57 = vsub.s32 0, %v112_v55  ;;  %v214_v59 = vadd.s32 536870912, %v213_v58  ;;  %v141_v41 = vadd.s32 3, %v137_v36 }
  0x49   :  { %v340_v53 = vmin.u32 %v114_v57, %v112_v55  ;;  %v215_v61 = vshrl.u32 %v214_v59, 30  ;;  %v142_v43 = vand.u32 3, %v141_v41 }
  0x4b   :  { %v116_v60 = vclz %v340_v53  ;;  %v216_v63 = vshll.u32 %v215_v61, 30  ;;  %v239_v28 = vsub.s32 4, %v215_v61  ;;  %vm147_vm2 = vcmp.eq.s32.totalorder %v142_v43, 2 }
  0x4c   :  { %vm144_vm3 = vcmp.eq.s32.totalorder %v142_v43, 0  ;;  %vm143_vm4 = vcmp.lt.s32.totalorder %v142_v43, 2 }
  0x4d   :  { %v341_v62 = vadd.s32 4294967294, %v116_v60  ;;  %v217_v2 = vsub.s32 %v213_v58, %v216_v63  ;;  %v240_v45 = vsel %vm155_vm0, %v239_v28, %v215_v61  ;;  %v348_v61 = vld [vmem:[#allocation2 + $0x3] ss:$0 sm:$0xff] }
  0x4e   :  { %v242_v49 = vsel %vm521_vm1, 0, %v240_v45 }
  0x4f   :  { %vm342_vm12 = vcmp.lt.s32.totalorder %v341_v62, 0  ;;  %v219_v6 = vsub.s32 0, %v217_v2  ;;  %v246_v54 = vadd.s32 3, %v242_v49 }
  0x50   :  { %v119_v1 = vsel %vm342_vm12, 0, %v341_v62  ;;  %v347_v62 = vld [vmem:[#allocation2 + $0x4] ss:$0 sm:$0xff] }
  0x51   :  { %v120_v3 = vsub.s32 32, %v119_v1  ;;  %v121_v4 = vshll.u32 %v112_v55, %v119_v1  ;;  %v124_v5 = vsub.s32 4294967266, %v119_v1  ;;  %v344_v14 = vmin.u32 %v219_v6, %v217_v2 }
  0x52   :  { %v247_v58 = vand.u32 3, %v246_v54 }
  0x53   :  { %v122_v7 = vshrl.u32 %v104_v0, %v120_v3  ;;  %v125_v13 = vadd.s32 127, %v124_v5  ;;  %v221_v18 = vclz %v344_v14 }
  0x54   :  { %vm252_vm6 = vcmp.eq.s32.totalorder %v247_v58, 2  ;;  %vm249_vm7 = vcmp.eq.s32.totalorder %v247_v58, 0  ;;  %vm248_vm8 = vcmp.lt.s32.totalorder %v247_v58, 2 }
  0x55   :  { %v123_v16 = vor.u32 %v122_v7, %v121_v4  ;;  %v126_v17 = vshll.u32 %v125_v13, 23  ;;  %v345_v21 = vadd.s32 4294967294, %v221_v18 }
  0x57   :  { %v127_v19 = vor.u32 4788187, %v126_v17  ;;  %v130_v20 = vcvt.s32.f32 %v123_v16  ;;  %vm346_vm13 = vcmp.lt.s32.totalorder %v345_v21, 0 }
  0x58   :  { %v224_v25 = vsel %vm346_vm13, 0, %v345_v21 }
  0x59   :  { %v128_v23 = vand.u32 2147483647, %v127_v19  ;;  %v225_v26 = vsub.s32 32, %v224_v25  ;;  %v226_v29 = vshll.u32 %v217_v2, %v224_v25  ;;  %v229_v30 = vsub.s32 4294967266, %v224_v25 }
  0x5b   :  { %v131_v11 = vmul.f32 %v130_v20, %v128_v23  ;;  %v227_v32 = vshrl.u32 %v209_v8, %v225_v26  ;;  %v230_v33 = vadd.s32 127, %v229_v30 }
  0x5d   :  { %v132_v27 = vxor.u32 2147483648, %v131_v11  ;;  %v228_v37 = vor.u32 %v227_v32, %v226_v29  ;;  %v231_v38 = vshll.u32 %v230_v33, 23 }
  0x5f   :  { %v133_v34 = vsel %vm50_vm14, %v132_v27, %v131_v11  ;;  %v232_v39 = vor.u32 4788187, %v231_v38  ;;  %v235_v40 = vcvt.s32.f32 %v228_v37 }
  0x60   :  { %v136_v35 = vsel %vm49_vm15, %v455_v9, %v133_v34 }
  0x61   :  { %367 = vcosq.f32 %v136_v35  ;;  %v233_v22 = vand.u32 2147483647, %v232_v39 }
  0x62   :  { %369 = vsinq.f32 %v136_v35 }
  0x63   :  { %v236_v42 = vmul.f32 %v235_v40, %v233_v22 }
  0x65   :  { %v237_v44 = vxor.u32 2147483648, %v236_v42 }
  0x67   :  { %v238_v46 = vsel %vm155_vm0, %v237_v44, %v236_v42 }
  0x68   :  { %v241_v48 = vsel %vm521_vm1, %v460_v12, %v238_v46 }
  0x69   :  { %371 = vcosq.f32 %v241_v48 }
  0x6a   :  { %373 = vsinq.f32 %v241_v48 }
  0x6b   :  { %v368_v47 = vpop.eup %367 }
  0x6c   :  { %v370_v50 = vpop.eup %369  ;;  %v148_v51 = vxor.u32 2147483648, %v368_v47 }
  0x6d   :  { %v145_v15 = vxor.u32 2147483648, %v370_v50 }
  0x6e   :  { %v149_v52 = vsel %vm147_vm2, %v148_v51, %v370_v50 }
  0x6f   :  { %v146_v55 = vsel %vm144_vm3, %v368_v47, %v145_v15 }
  0x70   :  { %v150_v56 = vsel %vm143_vm4, %v146_v55, %v149_v52 }
  0x71   :  { %v151_v57 = vsel %vm140_vm5, nan, %v150_v56 }
  0x72   :  { %257 = vst [vmem:[#allocation5] sm:$0xff] %v151_v57  ;;  %v262_v2 = vmul.f32 %v347_v62, %v151_v57  ;;  %v270_v3 = vmul.f32 %v348_v61, %v151_v57 }
  0x73   :  { %v372_v53 = vpop.eup %371 }
  0x74   :  { %v374_v59 = vpop.eup %373  ;;  %v253_v60 = vxor.u32 2147483648, %v372_v53 }
  0x75   :  { %v250_v63 = vxor.u32 2147483648, %v374_v59 }
  0x76   :  { %v254_v0 = vsel %vm252_vm6, %v253_v60, %v374_v59 }
  0x77   :  { %v251_v9 = vsel %vm249_vm7, %v372_v53, %v250_v63 }
  0x78   :  { %v255_v1 = vsel %vm248_vm8, %v251_v9, %v254_v0 }
  0x79   :  { %v256_v4 = vsel %vm245_vm9, nan, %v255_v1 }
  0x7a   :  { %v269_v5 = vmul.f32 %v347_v62, %v256_v4  ;;  %v267_v6 = vmul.f32 %v348_v61, %v256_v4 }
  0x7c   :  { %v271_v7 = vsub.f32 %v269_v5, %v270_v3  ;;  %v268_v13 = vadd.f32 %v267_v6, %v262_v2 }
  0x7e   :  { %v277_v14 = vmul.f32 %v347_v62, %v271_v7  ;;  %273 = vst [vmem:[#allocation5 + $0x8] sm:$0xff] %v268_v13  ;;  %v278_v16 = vmul.f32 %v348_v61, %v268_v13  ;;  %v274_v17 = vmul.f32 %v347_v62, %v268_v13  ;;  %v275_v18 = vmul.f32 %v348_v61, %v271_v7 }
  0x80   :  { %v276_v19 = vadd.f32 %v275_v18, %v274_v17  ;;  %v279_v20 = vsub.f32 %v277_v14, %v278_v16 }
  0x82   :  { %281 = vst [vmem:[#allocation5 + $0x10] sm:$0xff] %v276_v19  ;;  %v286_v21 = vmul.f32 %v348_v61, %v276_v19  ;;  %v282_v12 = vmul.f32 %v347_v62, %v276_v19  ;;  %v283_v23 = vmul.f32 %v348_v61, %v279_v20  ;;  %v285_v24 = vmul.f32 %v347_v62, %v279_v20 }
  0x84   :  { %v284_v8 = vadd.f32 %v283_v23, %v282_v12  ;;  %v287_v11 = vsub.f32 %v285_v24, %v286_v21 }
  0x86   :  { %289 = vst [vmem:[#allocation5 + $0x18] sm:$0xff] %v284_v8  ;;  %v294_v25 = vmul.f32 %v348_v61, %v284_v8  ;;  %v290_v26 = vmul.f32 %v347_v62, %v284_v8  ;;  %v291_v29 = vmul.f32 %v348_v61, %v287_v11  ;;  %v293_v30 = vmul.f32 %v347_v62, %v287_v11 }
  0x88   :  { %v292_v27 = vadd.f32 %v291_v29, %v290_v26  ;;  %v295_v31 = vsub.f32 %v293_v30, %v294_v25 }
  0x8a   :  { %297 = vst [vmem:[#allocation5 + $0x20] sm:$0xff] %v292_v27  ;;  %v298_v32 = vmul.f32 %v347_v62, %v292_v27  ;;  %v299_v33 = vmul.f32 %v348_v61, %v295_v31  ;;  %v301_v34 = vmul.f32 %v347_v62, %v295_v31  ;;  %v302_v35 = vmul.f32 %v348_v61, %v292_v27 }
  0x8c   :  { %v300_v36 = vadd.f32 %v299_v33, %v298_v32  ;;  %v303_v37 = vsub.f32 %v301_v34, %v302_v35 }
  0x8e   :  { %305 = vst [vmem:[#allocation5 + $0x28] sm:$0xff] %v300_v36  ;;  %v306_v38 = vmul.f32 %v347_v62, %v300_v36  ;;  %v307_v39 = vmul.f32 %v348_v61, %v303_v37  ;;  %v309_v40 = vmul.f32 %v347_v62, %v303_v37  ;;  %v310_v41 = vmul.f32 %v348_v61, %v300_v36 }
  0x90   :  { %v308_v22 = vadd.f32 %v307_v39, %v306_v38  ;;  %v311_v28 = vsub.f32 %v309_v40, %v310_v41 }
  0x92   :  { %313 = vst [vmem:[#allocation5 + $0x30] sm:$0xff] %v308_v22  ;;  %v314_v42 = vmul.f32 %v347_v62, %v308_v22  ;;  %v315_v43 = vmul.f32 %v348_v61, %v311_v28 }
  0x94   :  { %v316_v10 = vadd.f32 %v315_v43, %v314_v42 }
  0x96   :  { %318 = vst [vmem:[#allocation5 + $0x38] sm:$0xff] %v316_v10 }
  0x97   :  { %408 = shalt.err (!%p405_p12)
}
  0x98   :  { %s409_s22 = scalar_lea.hbm %s545_s1, 1024 }
  0x99   :  { %p410_p13 = scmp.ne.s32.totalorder %s545_s1, %s409_s22  ;;  %p413_p0 = scmp.lt.u32.totalorder %s409_s22, %s545_s1 }
  0x9b   :  { %p415_p1 = pnand %p413_p0, %p410_p13 }
  0x9d   :  { %418 = shalt.err (!%p415_p1)
}
  0x9e   :  { %s431_s27 = smov 128   ;;  %s432_s28 = smov 8  }
  0x9f   :  { %330 = dma.vmem_to_hbm [thread:$0]  %s325_s18, 1024, %s545_s1, [#allocation4], %s431_s27, %s431_s27, %s432_s28  }
  0xa0   :  { %421 = dma.done.wait [#allocation4], 1024  }
  0xa1   :  { %422 = vsyncadd [#allocation4], 4294966272 }
  0xa2   :  { %334 = vsyncpa [#allocation3], 1 }
  0xa3   :  { %335 = vsyncpa [#allocation4], 1 }

</bundles_post_ra>
